<compile_context>
chip_gen: v7x
topology: tpu7x:2x2x1
jax: 0.10.0
libtpu: 0.0.40
codegen_flags: <defaults>
</compile_context>

<pallas_src>
import functools

import jax
import jax.numpy as jnp
from jax.experimental import pallas as pl
from jax.experimental.pallas import tpu as pltpu


def _double_conv_kernel(x_ref, t1_ref, b1_ref, t2_ref, b2_ref, o_ref, mid_ref,
                        *, h):
    # x_ref:  (1, H+2, W*Cin)  f32, height-padded, (W, C) flattened on lanes
    # t1_ref: (3, W*Cin,  W*Cmid)   block-Toeplitz weights, one per kernel row
    # b1_ref: (1, W*Cmid)           bias tiled across width
    # t2_ref: (3, W*Cmid, W*Cout)
    # b2_ref: (1, W*Cout)
    # o_ref:  (1, H, W*Cout)
    # mid_ref: VMEM scratch (H+2, W*Cmid) -- height-padded conv1 output

    xf = x_ref[0]  # (H+2, W*Cin)

    # ---- conv1: 3 MXU matmuls (one per kernel row dy); width taps + channel
    # contraction are folded into the Toeplitz weight matrices.
    acc1 = jnp.dot(xf[0:h, :], t1_ref[0], preferred_element_type=jnp.float32)
    acc1 = acc1 + jnp.dot(xf[1:h + 1, :], t1_ref[1],
                          preferred_element_type=jnp.float32)
    acc1 = acc1 + jnp.dot(xf[2:h + 2, :], t1_ref[2],
                          preferred_element_type=jnp.float32)
    acc1 = acc1 + b1_ref[...]

    # ---- stage intermediate in VMEM with zero pad rows (SAME padding in H);
    # interior store is lane-aligned and full-width.
    wcm = mid_ref.shape[1]
    mid_ref[0:1, :] = jnp.zeros((1, wcm), dtype=mid_ref.dtype)
    mid_ref[h + 1:h + 2, :] = jnp.zeros((1, wcm), dtype=mid_ref.dtype)
    mid_ref[1:h + 1, :] = acc1

    # ---- conv2: same structure on the staged intermediate.
    acc2 = jnp.dot(mid_ref[0:h, :], t2_ref[0],
                   preferred_element_type=jnp.float32)
    acc2 = acc2 + jnp.dot(mid_ref[1:h + 1, :], t2_ref[1],
                          preferred_element_type=jnp.float32)
    acc2 = acc2 + jnp.dot(mid_ref[2:h + 2, :], t2_ref[2],
                          preferred_element_type=jnp.float32)
    acc2 = acc2 + b2_ref[...]

    o_ref[0] = acc2.astype(o_ref.dtype)


def _conv_toeplitz(wt, width):
    """(Cout, Cin, 3, 3) OIHW weights -> (3, width*Cin, width*Cout).

    For each kernel row dy, builds the block-Toeplitz matrix T[dy] such that
      out_flat[h] = sum_dy in_flat[h + dy] @ T[dy]
    where in_flat / out_flat flatten (W, C) onto one axis.  Width SAME-padding
    is handled implicitly: out-of-range taps are just dropped (their inputs
    would be zero).
    """
    c_out, c_in = wt.shape[0], wt.shape[1]
    mats = []
    for dy in range(3):
        t = jnp.zeros((width * c_in, width * c_out), jnp.float32)
        for dx in range(3):
            # shift[x_in, x_out] = 1  iff  x_in == x_out + dx - 1
            shift = jnp.eye(width, width, k=1 - dx, dtype=jnp.float32)
            tap = wt[:, :, dy, dx].T.astype(jnp.float32)  # (Cin, Cout)
            t = t + jnp.kron(shift, tap)
        mats.append(t)
    return jnp.stack(mats)  # (3, width*Cin, width*Cout)


def double_cov(x, w1, b1, w2, b2):
    """Pallas equivalent of DoubleCov.forward(x).

    x:  (N, Cin, H, W)          NCHW, like PyTorch
    w1: (Cmid, Cin, 3, 3), b1: (Cmid,)
    w2: (Cout, Cmid, 3, 3), b2: (Cout,)
    returns (N, Cout, H, W)
    """
    n, c_in, h, w = x.shape
    c_mid = w1.shape[0]
    c_out = w2.shape[0]
    assert w1.shape == (c_mid, c_in, 3, 3)
    assert w2.shape == (c_out, c_mid, 3, 3)

    # NCHW -> NHWC, pad H by 1 (W padding folded into Toeplitz weights), then
    # flatten (W, C) onto the lane axis.
    x_nhwc = jnp.transpose(x, (0, 2, 3, 1)).astype(jnp.float32)
    x_hpad = jnp.pad(x_nhwc, ((0, 0), (1, 1), (0, 0), (0, 0)))
    x_flat = x_hpad.reshape(n, h + 2, w * c_in)

    t1 = _conv_toeplitz(w1, w)                                   # (3, w*Cin,  w*Cmid)
    t2 = _conv_toeplitz(w2, w)                                   # (3, w*Cmid, w*Cout)
    b1t = jnp.tile(b1.astype(jnp.float32), w).reshape(1, w * c_mid)
    b2t = jnp.tile(b2.astype(jnp.float32), w).reshape(1, w * c_out)

    kernel = functools.partial(_double_conv_kernel, h=h)

    out_flat = pl.pallas_call(
        kernel,
        out_shape=jax.ShapeDtypeStruct((n, h, w * c_out), x.dtype),
        grid_spec=pltpu.PrefetchScalarGridSpec(
            num_scalar_prefetch=0,
            grid=(n,),
            in_specs=[
                pl.BlockSpec((1, h + 2, w * c_in), lambda b: (b, 0, 0)),
                pl.BlockSpec((3, w * c_in, w * c_mid), lambda b: (0, 0, 0)),
                pl.BlockSpec((1, w * c_mid), lambda b: (0, 0)),
                pl.BlockSpec((3, w * c_mid, w * c_out), lambda b: (0, 0, 0)),
                pl.BlockSpec((1, w * c_out), lambda b: (0, 0)),
            ],
            out_specs=pl.BlockSpec((1, h, w * c_out), lambda b: (b, 0, 0)),
            scratch_shapes=[pltpu.VMEM((h + 2, w * c_mid), jnp.float32)],
        ),
        compiler_params=pltpu.CompilerParams(
            dimension_semantics=("parallel",),
        ),
    )(x_flat, t1, b1t, t2, b2t)

    # (N, H, W*Cout) -> (N, H, W, Cout) -> NCHW
    return jnp.transpose(out_flat.reshape(n, h, w, c_out), (0, 3, 1, 2))


def double_cov_ref(x, w1, b1, w2, b2):
    """Pure-JAX reference mirroring the PyTorch forward (two SAME 3x3 convs)."""
    dn = ("NCHW", "OIHW", "NCHW")
    y = jax.lax.conv_general_dilated(
        x, w1, window_strides=(1, 1), padding="SAME", dimension_numbers=dn)
    y = y + b1[None, :, None, None]
    y = jax.lax.conv_general_dilated(
        y, w2, window_strides=(1, 1), padding="SAME", dimension_numbers=dn)
    y = y + b2[None, :, None, None]
    return y


if __name__ == "__main__":
    key = jax.random.PRNGKey(0)
    kx, kw1, kb1, kw2, kb2 = jax.random.split(key, 5)

    # Small shapes consistent with DoubleCov(in_channel=4, out_channel_1=8, out_channel_2=4)
    n, c_in, h, w = 2, 4, 16, 16
    c_mid, c_out = 8, 4

    x = jax.random.normal(kx, (n, c_in, h, w), dtype=jnp.float32)
    w1 = jax.random.normal(kw1, (c_mid, c_in, 3, 3), dtype=jnp.float32) * 0.1
    b1 = jax.random.normal(kb1, (c_mid,), dtype=jnp.float32) * 0.1
    w2 = jax.random.normal(kw2, (c_out, c_mid, 3, 3), dtype=jnp.float32) * 0.1
    b2 = jax.random.normal(kb2, (c_out,), dtype=jnp.float32) * 0.1

    out = double_cov(x, w1, b1, w2, b2)
    jax.block_until_ready(out)

    expected = double_cov_ref(x, w1, b1, w2, b2)
    assert out.shape == (n, c_out, h, w), out.shape
    assert jnp.allclose(out, expected, atol=2e-4, rtol=2e-4), (
        "Pallas output mismatch vs reference: max abs err = "
        f"{jnp.max(jnp.abs(out - expected))}"
    )

    print("KERNEL_OK")
</pallas_src>

<mosaic_0001>
module attributes {stable_mosaic.version = 11 : i64} {
  func.func @_double_conv_kernel(%arg0: i32, %arg1: memref<1x18x64xf32, #tpu.memory_space<vmem>>, %arg2: memref<3x64x128xf32, #tpu.memory_space<vmem>>, %arg3: memref<1x128xf32, #tpu.memory_space<vmem>>, %arg4: memref<3x128x64xf32, #tpu.memory_space<vmem>>, %arg5: memref<1x64xf32, #tpu.memory_space<vmem>>, %arg6: memref<1x16x64xf32, #tpu.memory_space<vmem>>, %arg7: memref<18x128xf32, #tpu.memory_space<vmem>>) attributes {dimension_semantics = [#tpu.dimension_semantics<parallel>], iteration_bounds = array<i64: 2>, scalar_prefetch = 0 : i64, scratch_operands = 1 : i64, tpu.core_type = #tpu.core_type<tc>, window_params = [{transform_indices = @transform_0, window_bounds = array<i64: 1, 18, 64>}, {pipeline_mode = #tpu.pipeline_mode<synchronous>, transform_indices = @transform_1, window_bounds = array<i64: 3, 64, 128>}, {pipeline_mode = #tpu.pipeline_mode<synchronous>, transform_indices = @transform_2, window_bounds = array<i64: 1, 128>}, {pipeline_mode = #tpu.pipeline_mode<synchronous>, transform_indices = @transform_3, window_bounds = array<i64: 3, 128, 64>}, {pipeline_mode = #tpu.pipeline_mode<synchronous>, transform_indices = @transform_4, window_bounds = array<i64: 1, 64>}, {transform_indices = @transform_5, window_bounds = array<i64: 1, 16, 64>}]} {
    %c0 = arith.constant 0 : index
    %c0_0 = arith.constant 0 : index
    %c0_1 = arith.constant 0 : index
    %0 = vector.load %arg1[%c0, %c0_0, %c0_1] : memref<1x18x64xf32, #tpu.memory_space<vmem>>, vector<1x18x64xf32>
    %1 = vector.shape_cast %0 : vector<1x18x64xf32> to vector<18x64xf32>
    %2 = vector.extract_strided_slice %1 {offsets = [0, 0], sizes = [16, 64], strides = [1, 1]} : vector<18x64xf32> to vector<16x64xf32>
    %c0_2 = arith.constant 0 : index
    %c0_3 = arith.constant 0 : index
    %c0_4 = arith.constant 0 : index
    %3 = vector.load %arg2[%c0_2, %c0_3, %c0_4] : memref<3x64x128xf32, #tpu.memory_space<vmem>>, vector<1x64x128xf32>
    %4 = vector.shape_cast %3 : vector<1x64x128xf32> to vector<64x128xf32>
    %cst = arith.constant dense<0.000000e+00> : vector<16x128xf32>
    %5 = tpu.matmul %2, %4, %cst {dimension_numbers = #tpu.dot_dimension_numbers<[1], [0], [0], [1], [0, 0, 1, 1], [], []>} : vector<16x64xf32>, vector<64x128xf32>, vector<16x128xf32> -> vector<16x128xf32>
    %6 = vector.extract_strided_slice %1 {offsets = [1, 0], sizes = [16, 64], strides = [1, 1]} : vector<18x64xf32> to vector<16x64xf32>
    %c1 = arith.constant 1 : index
    %c0_5 = arith.constant 0 : index
    %c0_6 = arith.constant 0 : index
    %7 = vector.load %arg2[%c1, %c0_5, %c0_6] : memref<3x64x128xf32, #tpu.memory_space<vmem>>, vector<1x64x128xf32>
    %8 = vector.shape_cast %7 : vector<1x64x128xf32> to vector<64x128xf32>
    %cst_7 = arith.constant dense<0.000000e+00> : vector<16x128xf32>
    %9 = tpu.matmul %6, %8, %cst_7 {dimension_numbers = #tpu.dot_dimension_numbers<[1], [0], [0], [1], [0, 0, 1, 1], [], []>} : vector<16x64xf32>, vector<64x128xf32>, vector<16x128xf32> -> vector<16x128xf32>
    %10 = arith.addf %5, %9 : vector<16x128xf32>
    %11 = vector.extract_strided_slice %1 {offsets = [2, 0], sizes = [16, 64], strides = [1, 1]} : vector<18x64xf32> to vector<16x64xf32>
    %c2 = arith.constant 2 : index
    %c0_8 = arith.constant 0 : index
    %c0_9 = arith.constant 0 : index
    %12 = vector.load %arg2[%c2, %c0_8, %c0_9] : memref<3x64x128xf32, #tpu.memory_space<vmem>>, vector<1x64x128xf32>
    %13 = vector.shape_cast %12 : vector<1x64x128xf32> to vector<64x128xf32>
    %cst_10 = arith.constant dense<0.000000e+00> : vector<16x128xf32>
    %14 = tpu.matmul %11, %13, %cst_10 {dimension_numbers = #tpu.dot_dimension_numbers<[1], [0], [0], [1], [0, 0, 1, 1], [], []>} : vector<16x64xf32>, vector<64x128xf32>, vector<16x128xf32> -> vector<16x128xf32>
    %15 = arith.addf %10, %14 : vector<16x128xf32>
    %c0_11 = arith.constant 0 : index
    %c0_12 = arith.constant 0 : index
    %16 = vector.load %arg3[%c0_11, %c0_12] : memref<1x128xf32, #tpu.memory_space<vmem>>, vector<1x128xf32>
    %17 = vector.broadcast %16 : vector<1x128xf32> to vector<16x128xf32>
    %18 = arith.addf %15, %17 : vector<16x128xf32>
    %cst_13 = arith.constant 0.000000e+00 : f32
    %19 = vector.broadcast %cst_13 : f32 to vector<1x128xf32>
    %c0_14 = arith.constant 0 : index
    %c0_15 = arith.constant 0 : index
    %20 = vector.load %arg7[%c0_14, %c0_15] : memref<18x128xf32, #tpu.memory_space<vmem>>, vector<1x128xf32>
    tpu.vector_store %arg7[%c0_14, %c0_15], %19 {strides = array<i32>} : memref<18x128xf32, #tpu.memory_space<vmem>>, vector<1x128xf32>,
    %cst_16 = arith.constant 0.000000e+00 : f32
    %21 = vector.broadcast %cst_16 : f32 to vector<1x128xf32>
    %c17 = arith.constant 17 : index
    %c0_17 = arith.constant 0 : index
    %22 = vector.load %arg7[%c17, %c0_17] : memref<18x128xf32, #tpu.memory_space<vmem>>, vector<1x128xf32>
    tpu.vector_store %arg7[%c17, %c0_17], %21 {strides = array<i32>} : memref<18x128xf32, #tpu.memory_space<vmem>>, vector<1x128xf32>,
    %c1_18 = arith.constant 1 : index
    %c0_19 = arith.constant 0 : index
    %23 = vector.load %arg7[%c1_18, %c0_19] : memref<18x128xf32, #tpu.memory_space<vmem>>, vector<16x128xf32>
    tpu.vector_store %arg7[%c1_18, %c0_19], %18 {strides = array<i32>} : memref<18x128xf32, #tpu.memory_space<vmem>>, vector<16x128xf32>,
    %c0_20 = arith.constant 0 : index
    %c0_21 = arith.constant 0 : index
    %24 = vector.load %arg7[%c0_20, %c0_21] : memref<18x128xf32, #tpu.memory_space<vmem>>, vector<16x128xf32>
    %c0_22 = arith.constant 0 : index
    %c0_23 = arith.constant 0 : index
    %c0_24 = arith.constant 0 : index
    %25 = vector.load %arg4[%c0_22, %c0_23, %c0_24] : memref<3x128x64xf32, #tpu.memory_space<vmem>>, vector<1x128x64xf32>
    %26 = vector.shape_cast %25 : vector<1x128x64xf32> to vector<128x64xf32>
    %cst_25 = arith.constant dense<0.000000e+00> : vector<16x64xf32>
    %27 = tpu.matmul %24, %26, %cst_25 {dimension_numbers = #tpu.dot_dimension_numbers<[1], [0], [0], [1], [0, 0, 1, 1], [], []>} : vector<16x128xf32>, vector<128x64xf32>, vector<16x64xf32> -> vector<16x64xf32>
    %c1_26 = arith.constant 1 : index
    %c0_27 = arith.constant 0 : index
    %28 = vector.load %arg7[%c1_26, %c0_27] : memref<18x128xf32, #tpu.memory_space<vmem>>, vector<16x128xf32>
    %c1_28 = arith.constant 1 : index
    %c0_29 = arith.constant 0 : index
    %c0_30 = arith.constant 0 : index
    %29 = vector.load %arg4[%c1_28, %c0_29, %c0_30] : memref<3x128x64xf32, #tpu.memory_space<vmem>>, vector<1x128x64xf32>
    %30 = vector.shape_cast %29 : vector<1x128x64xf32> to vector<128x64xf32>
    %cst_31 = arith.constant dense<0.000000e+00> : vector<16x64xf32>
    %31 = tpu.matmul %28, %30, %cst_31 {dimension_numbers = #tpu.dot_dimension_numbers<[1], [0], [0], [1], [0, 0, 1, 1], [], []>} : vector<16x128xf32>, vector<128x64xf32>, vector<16x64xf32> -> vector<16x64xf32>
    %32 = arith.addf %27, %31 : vector<16x64xf32>
    %c2_32 = arith.constant 2 : index
    %c0_33 = arith.constant 0 : index
    %33 = vector.load %arg7[%c2_32, %c0_33] : memref<18x128xf32, #tpu.memory_space<vmem>>, vector<16x128xf32>
    %c2_34 = arith.constant 2 : index
    %c0_35 = arith.constant 0 : index
    %c0_36 = arith.constant 0 : index
    %34 = vector.load %arg4[%c2_34, %c0_35, %c0_36] : memref<3x128x64xf32, #tpu.memory_space<vmem>>, vector<1x128x64xf32>
    %35 = vector.shape_cast %34 : vector<1x128x64xf32> to vector<128x64xf32>
    %cst_37 = arith.constant dense<0.000000e+00> : vector<16x64xf32>
    %36 = tpu.matmul %33, %35, %cst_37 {dimension_numbers = #tpu.dot_dimension_numbers<[1], [0], [0], [1], [0, 0, 1, 1], [], []>} : vector<16x128xf32>, vector<128x64xf32>, vector<16x64xf32> -> vector<16x64xf32>
    %37 = arith.addf %32, %36 : vector<16x64xf32>
    %c0_38 = arith.constant 0 : index
    %c0_39 = arith.constant 0 : index
    %38 = vector.load %arg5[%c0_38, %c0_39] : memref<1x64xf32, #tpu.memory_space<vmem>>, vector<1x64xf32>
    %39 = vector.broadcast %38 : vector<1x64xf32> to vector<16x64xf32>
    %40 = arith.addf %37, %39 : vector<16x64xf32>
    %c0_40 = arith.constant 0 : index
    %c0_41 = arith.constant 0 : index
    %c0_42 = arith.constant 0 : index
    %41 = vector.load %arg6[%c0_40, %c0_41, %c0_42] : memref<1x16x64xf32, #tpu.memory_space<vmem>>, vector<1x16x64xf32>
    %42 = vector.shape_cast %41 : vector<1x16x64xf32> to vector<16x64xf32>
    %43 = vector.shape_cast %40 : vector<16x64xf32> to vector<1x16x64xf32>
    tpu.vector_store %arg6[%c0_40, %c0_41, %c0_42], %43 {strides = array<i32>} : memref<1x16x64xf32, #tpu.memory_space<vmem>>, vector<1x16x64xf32>,
    return
  }
  func.func @transform_0(%arg0: i32) -> (i32, i32, i32) {
    %c0_i32 = arith.constant 0 : i32
    %c0_i32_0 = arith.constant 0 : i32
    %c0_i32_1 = arith.constant 0 : i32
    return %arg0, %c0_i32, %c0_i32_0 : i32, i32, i32
  }
  func.func @transform_1(%arg0: i32) -> (i32, i32, i32) {
    %c0_i32 = arith.constant 0 : i32
    %c0_i32_0 = arith.constant 0 : i32
    %c0_i32_1 = arith.constant 0 : i32
    %c0_i32_2 = arith.constant 0 : i32
    return %c0_i32, %c0_i32_0, %c0_i32_1 : i32, i32, i32
  }
  func.func @transform_2(%arg0: i32) -> (i32, i32) {
    %c0_i32 = arith.constant 0 : i32
    %c0_i32_0 = arith.constant 0 : i32
    %c0_i32_1 = arith.constant 0 : i32
    return %c0_i32, %c0_i32_0 : i32, i32
  }
  func.func @transform_3(%arg0: i32) -> (i32, i32, i32) {
    %c0_i32 = arith.constant 0 : i32
    %c0_i32_0 = arith.constant 0 : i32
    %c0_i32_1 = arith.constant 0 : i32
    %c0_i32_2 = arith.constant 0 : i32
    return %c0_i32, %c0_i32_0, %c0_i32_1 : i32, i32, i32
  }
  func.func @transform_4(%arg0: i32) -> (i32, i32) {
    %c0_i32 = arith.constant 0 : i32
    %c0_i32_0 = arith.constant 0 : i32
    %c0_i32_1 = arith.constant 0 : i32
    return %c0_i32, %c0_i32_0 : i32, i32
  }
  func.func @transform_5(%arg0: i32) -> (i32, i32, i32) {
    %c0_i32 = arith.constant 0 : i32
    %c0_i32_0 = arith.constant 0 : i32
    %c0_i32_1 = arith.constant 0 : i32
    return %arg0, %c0_i32, %c0_i32_0 : i32, i32, i32
  }
}

</mosaic_0001>

<bundles_post_ra>
// kernel: tpu_custom_call.1
= control target key start
LH: loop header
LB: loop body
LE: loop exit
PB: predicated region body
PF: predicated region fallthrough
CT: control target
= control target key end

     0   :  { %10 = vsyncpa [#allocation4], 0  ;;  %s1848_s0 = inlined_call_operand.vmem [shape: f32[2,18,64], index: 0, kind: input, shape index: {}]   ;;  %s1849_s1 = inlined_call_operand.vmem [shape: f32[3,64,128], index: 1, kind: input, shape index: {}]   ;;  %s1850_s2 = inlined_call_operand.vmem [shape: f32[1,128], index: 2, kind: input, shape index: {}]   ;;  %s1851_s3 = inlined_call_operand.vmem [shape: f32[3,128,64], index: 3, kind: input, shape index: {}]   ;;  %s1852_s4 = inlined_call_operand.vmem [shape: f32[1,64], index: 4, kind: input, shape index: {}]   ;;  %s1853_s5 = inlined_call_operand.hbm [shape: f32[2,16,64], index: 5, kind: output, shape index: {}]  }
   0x1   :  { %12 = vsyncpa [#allocation4 + $0x1], 0  ;;  %s1497_s18 = smov 0   ;;  %s1499_s19 = smov 0  }
   0x2   :  { %s1501_s20 = smov 0   ;;  %s1503_s21 = smov 0  }
   0x3 LB: > { %s1518_s22 = sadd.s32 4294967295, %s1461_s21   ;;  %s890_s23 = sadd.s32 4294967294, %s1461_s21   ;;  %s1461_s21 = sphi %s1503_s21, %s1859_s21   ;;  %s1457_s20 = sphi %s1501_s20, %s1858_s20   ;;  %s1453_s19 = sphi %s1499_s19, %s1857_s19   ;;  %s1449_s18 = sphi %s1497_s18, %s1856_s18  }
   0x4   : > { %s1522_s24 = sadd.s32 1, %s1461_s21   ;;  %s135_s25 = sadd.s32 1, %s1457_s20 }
   0x5   : > { %s132_s26 = ssub.s32 %s1461_s21, %s1522_s24  ;;  %p145_p0 = scmp.ne.s32.totalorder %s1457_s20, %s1453_s19 }
   0x6   : > { %p133_p1 = scmp.eq.s32.totalorder %s132_s26, 0  ;;  %p146_p2 = scmp.eq.s32.totalorder %s1518_s22, 1 }
   0x7   : > { %p151_p3 = scmp.ne.s32.totalorder %s1453_s19, %s1449_s18  ;;  %p152_p4 = scmp.eq.s32.totalorder %s890_s23, 1 }
   0x8   : > { %s1533_s27 = scalar_select %p133_p1, %s1457_s20, %s135_s25  }
   0x9   : > { %p1535_p5 = por %p146_p2, %p145_p0  ;;  %p1539_p6 = por %p152_p4, %p151_p3 }
   0xa   : > { %p893_p7 = scmp.ge.s32.totalorder %s1461_s21, 1  ;;  %p190_p8 = scmp.lt.s32.totalorder %s1461_s21, 3 }
   0xc   : > { %p191_p9 = pnand %p893_p7, %p190_p8 }
   0xd   : > { %v896_v0 = vld [vmem:[%s1849_s1 + $0x40] sm:$0xff] (!%p191_p9)  ;;  %v897_v1 = vld [vmem:[%s1849_s1 + $0x48] sm:$0xff] (!%p191_p9)  ;;  %v898_v2 = vld [vmem:[%s1849_s1 + $0x50] sm:$0xff] (!%p191_p9)  ;;  %p218_p10 = scmp.lt.s32.totalorder (!%p191_p9), %s1518_s22, 1  ;;  %vm246_vm0 = vcmask (!%p191_p9), 1046528   ;;  %vm252_vm1 = vcmask (!%p191_p9), 523264  }
   0xe   : > { %194 = sbr.rel (%p191_p9) target bundleno = 552 (0x228), region = 40  ;;  %v1204_v3 = vpack.c.bf16 (!%p191_p9), %v897_v1, %v896_v0  ;;  %v899_v4 = vld [vmem:[%s1849_s1 + $0x58] sm:$0xff] (!%p191_p9)  ;;  %v900_v6 = vld [vmem:[%s1849_s1 + $0x60] sm:$0xff] (!%p191_p9)  ;;  %v901_v7 = vld [vmem:[%s1849_s1 + $0x68] sm:$0xff] (!%p191_p9)  ;;  %vm420_vm2 = vcmask (!%p191_p9), 1045504   ;;  %s215_s12 = sand.u32 (!%p191_p9), 1, %s1453_s19  }
   0xf   : > { %v1208_v5 = vpack.c.bf16 (!%p191_p9), %v899_v4, %v898_v2  ;;  %v1212_v8 = vpack.c.bf16 (!%p191_p9), %v901_v7, %v900_v6  ;;  %v902_v9 = vld [vmem:[%s1849_s1 + $0x70] sm:$0xff] (!%p191_p9)  ;;  %v903_v10 = vld [vmem:[%s1849_s1 + $0x78] sm:$0xff] (!%p191_p9)  ;;  %v522_v17 = vld [vmem:[%s1851_s3] sm:$0xff] (!%p191_p9)  ;;  %s894_s13 = sshll.u32 (!%p191_p9), %s215_s12, 4  ;;  %s1464_s7 = smov (!%p191_p9), [#allocation3]  }
  0x10   : > { %1205 = vmatprep.subr.bf16.mxu0 (!%p191_p9), %v1204_v3  ;;  %v1216_v15 = vpack.c.bf16 (!%p191_p9), %v903_v10, %v902_v9  ;;  %v523_v18 = vld [vmem:[%s1851_s3 + $0x8] sm:$0xff] (!%p191_p9)  ;;  %v226_v20 = vld [vmem:[%s1849_s1] sm:$0xff] (!%p191_p9)  ;;  %v524_v23 = vld [vmem:[%s1851_s3 + $0x10] sm:$0xff] (!%p191_p9)  ;;  %s217_s16 = scalar_lea.vmem (!%p191_p9), [#allocation3], %s894_s13  ;;  %s1403_s8 = sshll.u32 (!%p191_p9), %s1464_s7, 4  ;;  %s1404_s8 = int_to_ptr.vmem [resolvable:$false] %s1403_s8 }
  0x11   : > { %1207 = vmatpush3.bf16.msra.mxu0 (!%p191_p9), %v1204_v3  ;;  %v227_v21 = vld [vmem:[%s1849_s1 + $0x8] sm:$0xff] (!%p191_p9)  ;;  %v1284_v22 = vpack.c.bf16 (!%p191_p9), %v523_v18, %v522_v17  ;;  %v525_v24 = vld [vmem:[%s1851_s3 + $0x18] sm:$0xff] (!%p191_p9)  ;;  %v526_v27 = vld [vmem:[%s1851_s3 + $0x20] sm:$0xff] (!%p191_p9) }
  0x12   : > { %1209 = vmatprep.subr.bf16.mxu0 (!%p191_p9), %v1208_v5  ;;  %v1288_v26 = vpack.c.bf16 (!%p191_p9), %v525_v24, %v524_v23  ;;  %v527_v28 = vld [vmem:[%s1851_s3 + $0x28] sm:$0xff] (!%p191_p9)  ;;  %v1220_v29 = vpack.c.bf16 (!%p191_p9), %v227_v21, %v226_v20  ;;  %v228_v30 = vld [vmem:[%s1849_s1 + $0x10] sm:$0xff] (!%p191_p9)  ;;  %v229_v31 = vld [vmem:[%s1849_s1 + $0x18] sm:$0xff] (!%p191_p9) }
  0x13   : > { %1285 = vmatprep.subr.bf16.mxu1 (!%p191_p9), %v1284_v22  ;;  %v1292_v32 = vpack.c.bf16 (!%p191_p9), %v527_v28, %v526_v27  ;;  %v528_v33 = vld [vmem:[%s1851_s3 + $0x30] sm:$0xff] (!%p191_p9)  ;;  %v529_v34 = vld [vmem:[%s1851_s3 + $0x38] sm:$0xff] (!%p191_p9)  ;;  %v1224_v36 = vpack.c.bf16 (!%p191_p9), %v229_v31, %v228_v30  ;;  %v230_v37 = vld [vmem:[%s1849_s1 + $0x20] sm:$0xff] (!%p191_p9)  ;;  %v1463_v30 = vmov (!%p191_p9), 0.0  }
  0x14   : > { %1287 = vmatpush3.bf16.msra.mxu1 (!%p191_p9), %v1284_v22  ;;  %v231_v38 = vld [vmem:[%s1849_s1 + $0x28] sm:$0xff] (!%p191_p9)  ;;  %v1296_v39 = vpack.c.bf16 (!%p191_p9), %v529_v34, %v528_v33  ;;  %v530_v40 = vld [vmem:[%s1851_s3 + $0x40] sm:$0xff] (!%p191_p9)  ;;  %v232_v43 = vld [vmem:[%s1849_s1 + $0x30] sm:$0xff] (!%p191_p9)  ;;  %516 = vst [vmem:[#allocation2] sm:$0x1] (!%p191_p9), %v1463_v30 }
  0x15   : > { %s219_s17 = scalar_select %p218_p10, %s1518_s22, 1  ;;  %1211 = vmatpush3.bf16.msra.mxu0 %v1208_v5  ;;  %1289 = vmatprep.subr.bf16.mxu1 %v1288_v26  ;;  %v531_v41 = vld [vmem:[%s1851_s3 + $0x48] sm:$0xff]  ;;  %v1228_v42 = vpack.c.bf16 %v231_v38, %v230_v37  ;;  %v233_v44 = vld [vmem:[%s1849_s1 + $0x38] sm:$0xff]  ;;  %v908_v47 = vld [vmem:[%s1849_s1 + $0x80] sm:$0xff]  ;;  %517 = vst [vmem:[#allocation2 + $0x11] sm:$0x1] %v1463_v30 }
  0x16   : > { %1213 = vmatprep.subr.bf16.mxu0 %v1212_v8  ;;  %v1300_v45 = vpack.c.bf16 %v531_v41, %v530_v40  ;;  %v1232_v46 = vpack.c.bf16 %v233_v44, %v232_v43  ;;  %v909_v48 = vld [vmem:[%s1849_s1 + $0x88] sm:$0xff]  ;;  %v910_v52 = vld [vmem:[%s1849_s1 + $0x90] sm:$0xff]  ;;  %v911_v53 = vld [vmem:[%s1849_s1 + $0x98] sm:$0xff] }
  0x17   : > { %s1356_s23 = smul.u32 24, %s219_s17  ;;  %v1236_v49 = vpack.c.bf16 %v909_v48, %v908_v47  ;;  %v1240_v54 = vpack.c.bf16 %v911_v53, %v910_v52  ;;  %v912_v56 = vld [vmem:[%s1849_s1 + $0xa0] sm:$0xff]  ;;  %v913_v57 = vld [vmem:[%s1849_s1 + $0xa8] sm:$0xff]  ;;  %v914_v59 = vld [vmem:[%s1849_s1 + $0xb0] sm:$0xff]  ;;  %s828_s17 = sshll.u32 %s217_s16, 4  ;;  %s1803_s17 = int_to_ptr.vmem [resolvable:$true] %s828_s17 }
  0x18   : > { %1291 = vmatpush3.bf16.msra.mxu1 %v1288_v26  ;;  %v1244_v58 = vpack.c.bf16 %v913_v57, %v912_v56  ;;  %v915_v60 = vld [vmem:[%s1849_s1 + $0xb8] sm:$0xff]  ;;  %v919_v62 = vld [vmem:[%s1851_s3 + $0x80] sm:$0xff]  ;;  %v920_v63 = vld [vmem:[%s1851_s3 + $0x88] sm:$0xff]  ;;  %s1399_s6 = scalar_lea.vmem %s1803_s17, 256  ;;  %p1406_p0 = scmp.lt.s32.totalorder %s1803_s17, %s1404_s8 }
  0x19   : > { %s222_s9 = scalar_lea.vmem %s1848_s0, %s1356_s23  ;;  %1215 = vmatpush3.bf16.msra.mxu0 %v1212_v8  ;;  %1293 = vmatprep.subr.bf16.mxu1 %v1292_v32  ;;  %v1248_v61 = vpack.c.bf16 %v915_v60, %v914_v59  ;;  %v1252_v1 = vpack.c.bf16 %v920_v63, %v919_v62  ;;  %v921_v2 = vld [vmem:[%s1851_s3 + $0x90] sm:$0xff]  ;;  %v922_v3 = vld [vmem:[%s1851_s3 + $0x98] sm:$0xff]  ;;  %v923_v6 = vld [vmem:[%s1851_s3 + $0xa0] sm:$0xff]  ;;  %s957_s23 = sshll.u32 %s1518_s22, 8 }
  0x1a   : > { %v1574_v11 = vld [vmem:[%s222_s9] sm:$0xff]  ;;  %v1576_v12 = vld [vmem:[%s222_s9 + $0x8] sm:$0xff]  ;;  %v1580_v16 = vld [vmem:[%s222_s9 + $0x10] sm:$0x3]  ;;  %1217 = vmatprep.subr.bf16.mxu0 %v1216_v15  ;;  %v1256_v5 = vpack.c.bf16 %v922_v3, %v921_v2  ;;  %s1801_s30 = scalar_lea.hbm %s1853_s5, %s957_s23  ;;  %s1807_s22 = scalar_lea.sflag [#allocation4], %s215_s12 }
  0x1b   : > { %v247_v13 = vrot.slane %v1574_v11, 1  ;;  %v248_v14 = vrot.slane %v1576_v12, 1  ;;  %v250_v25 = vrot.slane %v1580_v16, 1  ;;  %v421_v50 = vrot.slane %v1574_v11, 2  ;;  %v924_v7 = vld [vmem:[%s1851_s3 + $0xa8] sm:$0xff]  ;;  %v925_v9 = vld [vmem:[%s1851_s3 + $0xb0] sm:$0xff]  ;;  %p1400_p11 = scmp.ne.s32.totalorder %s1803_s17, %s1399_s6 }
  0x1c   : > { %1295 = vmatpush3.bf16.msra.mxu1 %v1292_v32  ;;  %v422_v51 = vrot.slane %v1576_v12, 2  ;;  %v424_v0 = vrot.slane %v1580_v16, 2  ;;  %v1260_v8 = vpack.c.bf16 %v924_v7, %v923_v6  ;;  %v926_v10 = vld [vmem:[%s1851_s3 + $0xb8] sm:$0xff]  ;;  %v931_v18 = vld [vmem:[%s1851_s3 + $0xe0] sm:$0xff]  ;;  %v532_v21 = vld [vmem:[%s1851_s3 + $0x50] sm:$0xff]  ;;  %s1405_s9 = scalar_lea.vmem %s1404_s8, 512 }
  0x1d   : > { %v249_v19 = vsel %vm246_vm0, %v247_v13, %v248_v14  ;;  %1219 = vmatpush3.bf16.msra.mxu0 %v1216_v15  ;;  %v251_v35 = vsel %vm246_vm0, %v248_v14, %v250_v25  ;;  %1297 = vmatprep.subr.bf16.mxu1 %v1296_v39  ;;  %v928_v13 = vld [vmem:[%s1851_s3 + $0xc8] sm:$0xff]  ;;  %v929_v15 = vld [vmem:[%s1851_s3 + $0xd0] sm:$0xff]  ;;  %v930_v16 = vld [vmem:[%s1851_s3 + $0xd8] sm:$0xff]  ;;  %p1401_p12 = pnand %p1400_p11, %p1535_p5  ;;  %p1407_p1 = scmp.lt.s32.totalorder %s1405_s9, %s1399_s6 }
  0x1e   : > { %1058 = vmatprep.mubr.msk.f32.mxu0 %vm252_vm1, %v249_v19  ;;  %1221 = vmatprep.subr.bf16.mxu0 %v1220_v29  ;;  %v423_v55 = vsel %vm420_vm2, %v421_v50, %v422_v51  ;;  %v425_v4 = vsel %vm420_vm2, %v422_v51, %v424_v0  ;;  %v1272_v17 = vpack.c.bf16 %v930_v16, %v929_v15  ;;  %v932_v19 = vld [vmem:[%s1851_s3 + $0xe8] sm:$0xff]  ;;  %v533_v22 = vld [vmem:[%s1851_s3 + $0x58] sm:$0xff]  ;;  %v933_v24 = vld [vmem:[%s1851_s3 + $0xf0] sm:$0xff] }
  0x1f   : > { %v1276_v20 = vpack.c.bf16 %v932_v19, %v931_v18  ;;  %v1304_v23 = vpack.c.bf16 %v533_v22, %v532_v21  ;;  %v934_v25 = vld [vmem:[%s1851_s3 + $0xf8] sm:$0xff]  ;;  %v534_v27 = vld [vmem:[%s1851_s3 + $0x60] sm:$0xff]  ;;  %v535_v28 = vld [vmem:[%s1851_s3 + $0x68] sm:$0xff]  ;;  %p1402_p13 = pneg %p1401_p12  ;;  %p1408_p2 = por %p1407_p1, %p1406_p0 }
  0x20   : > { %1059 = vmatmul.mubr.msk.f32.vlgmr.msra.gmra.mrb[0].mxu0 %vm252_vm1, %v251_v35  ;;  %1299 = vmatpush3.bf16.msra.mxu1 %v1296_v39  ;;  %v1280_v26 = vpack.c.bf16 %v934_v25, %v933_v24  ;;  %v536_v31 = vld [vmem:[%s1851_s3 + $0x70] sm:$0xff]  ;;  %v537_v32 = vld [vmem:[%s1851_s3 + $0x78] sm:$0xff]  ;;  %v935_v34 = vld [vmem:[%s1851_s3 + $0x100] sm:$0xff] }
  0x21   : > { %1223 = vmatpush3.bf16.msra.mxu0 %v1220_v29  ;;  %1077 = vmatprep.mubr.msk.f32.mxu0 %vm252_vm1, %v1574_v11  ;;  %v1264_v11 = vpack.c.bf16 %v926_v10, %v925_v9  ;;  %v1308_v29 = vpack.c.bf16 %v535_v28, %v534_v27  ;;  %v1312_v33 = vpack.c.bf16 %v537_v32, %v536_v31  ;;  %v936_v35 = vld [vmem:[%s1851_s3 + $0x108] sm:$0xff]  ;;  %v918_v37 = vld [vmem:[%s1850_s2] ss:$0 sm:$0xff]  ;;  %v938_v43 = vld [vmem:[%s1851_s3 + $0x118] sm:$0xff]  ;;  %p1409_p3 = pnand %p1408_p2, %p1402_p13 }
  0x22   : > { %1225 = vmatprep.subr.bf16.mxu0 %v1224_v36  ;;  %1301 = vmatprep.subr.bf16.mxu1 %v1300_v45  ;;  %v939_v47 = vld [vmem:[%s1851_s3 + $0x120] sm:$0xff]  ;;  %v940_v48 = vld [vmem:[%s1851_s3 + $0x128] sm:$0xff]  ;;  %v941_v51 = vld [vmem:[%s1851_s3 + $0x130] sm:$0xff] }
  0x23   : > { %v1324_v50 = vpack.c.bf16 %v940_v48, %v939_v47  ;;  %v942_v52 = vld [vmem:[%s1851_s3 + $0x138] sm:$0xff]  ;;  %v945_v57 = vld [vmem:[%s1851_s3 + $0x150] sm:$0xff]  ;;  %v947_v60 = vld [vmem:[%s1851_s3 + $0x160] sm:$0xff] }
  0x24   : > { %1303 = vmatpush3.bf16.msra.mxu1 %v1300_v45  ;;  %v1328_v53 = vpack.c.bf16 %v942_v52, %v941_v51  ;;  %v949_v63 = vld [vmem:[%s1851_s3 + $0x170] sm:$0xff]  ;;  %v950_v0 = vld [vmem:[%s1851_s3 + $0x178] sm:$0xff]  ;;  %v951_v6 = vld [vmem:[%s1852_s4] ss:$0 sm:$0xff] }
  0x25   : > { %1227 = vmatpush3.bf16.msra.mxu0 %v1224_v36  ;;  %1305 = vmatprep.subr.bf16.mxu1 %v1304_v23  ;;  %v1316_v36 = vpack.c.bf16 %v936_v35, %v935_v34 }
  0x26   : > { %1229 = vmatprep.subr.bf16.mxu0 %v1228_v42 }
  0x28   : > { %1307 = vmatpush3.bf16.msra.mxu1 %v1304_v23 }
  0x29   : > { %1231 = vmatpush3.bf16.msra.mxu0 %v1228_v42  ;;  %1309 = vmatprep.subr.bf16.mxu1 %v1308_v29  ;;  %v937_v42 = vld [vmem:[%s1851_s3 + $0x110] sm:$0xff] }
  0x2a   : > { %1233 = vmatprep.subr.bf16.mxu0 %v1232_v46 }
  0x2c   : > { %1311 = vmatpush3.bf16.msra.mxu1 %v1308_v29 }
  0x2d   : > { %1235 = vmatpush3.bf16.msra.mxu0 %v1232_v46  ;;  %1313 = vmatprep.subr.bf16.mxu1 %v1312_v33  ;;  %v1320_v46 = vpack.c.bf16 %v938_v43, %v937_v42 }
  0x2e   : > { %1237 = vmatprep.subr.bf16.mxu0 %v1236_v49 }
  0x30   : > { %1078 = vmatmul.mubr.msk.f32.vlgmr.msra.gmra.mrb[0].mxu0 %vm252_vm1, %v1576_v12  ;;  %v927_v12 = vld [vmem:[%s1851_s3 + $0xc0] sm:$0xff]  ;;  %1315 = vmatpush3.bf16.msra.mxu1 %v1312_v33 }
  0x31   : > { %1239 = vmatpush3.bf16.msra.mxu0 %v1236_v49  ;;  %1096 = vmatprep.mubr.msk.f32.mxu0 %vm252_vm1, %v423_v55  ;;  %v1268_v14 = vpack.c.bf16 %v928_v13, %v927_v12  ;;  %v944_v55 = vld [vmem:[%s1851_s3 + $0x148] sm:$0xff] }
  0x32   : > { %1241 = vmatprep.subr.bf16.mxu0 %v1240_v54  ;;  %1317 = vmatprep.subr.bf16.mxu1 %v1316_v36 }
  0x35   : > { %1243 = vmatpush3.bf16.msra.mxu0 %v1240_v54  ;;  %v943_v54 = vld [vmem:[%s1851_s3 + $0x140] sm:$0xff] }
  0x36   : > { %1245 = vmatprep.subr.bf16.mxu0 %v1244_v58  ;;  %v1332_v56 = vpack.c.bf16 %v944_v55, %v943_v54 }
  0x39   : > { %1247 = vmatpush3.bf16.msra.mxu0 %v1244_v58  ;;  %v946_v58 = vld [vmem:[%s1851_s3 + $0x158] sm:$0xff] }
  0x3a   : > { %1249 = vmatprep.subr.bf16.mxu0 %v1248_v61  ;;  %v1336_v59 = vpack.c.bf16 %v946_v58, %v945_v57 }
  0x3d   : > { %1251 = vmatpush3.bf16.msra.mxu0 %v1248_v61  ;;  %v948_v61 = vld [vmem:[%s1851_s3 + $0x168] sm:$0xff] }
  0x3e   : > { %1253 = vmatprep.subr.bf16.mxu0 %v1252_v1  ;;  %v1340_v62 = vpack.c.bf16 %v948_v61, %v947_v60 }
  0x40   : > { %1097 = vmatmul.mubr.msk.f32.vlgmr.msra.gmra.mrb[0].mxu0 %vm252_vm1, %v425_v4 }
  0x41   : > { %1255 = vmatpush3.bf16.msra.mxu0 %v1252_v1  ;;  %v1344_v1 = vpack.c.bf16 %v950_v0, %v949_v63 }
  0x42   : > { %1257 = vmatprep.subr.bf16.mxu0 %v1256_v5 }
  0x45   : > { %1259 = vmatpush3.bf16.msra.mxu0 %v1256_v5 }
  0x46   : > { %1261 = vmatprep.subr.bf16.mxu0 %v1260_v8 }
  0x49   : > { %1263 = vmatpush3.bf16.msra.mxu0 %v1260_v8 }
  0x4a   : > { %1265 = vmatprep.subr.bf16.mxu0 %v1264_v11 }
  0x4d   : > { %1267 = vmatpush3.bf16.msra.mxu0 %v1264_v11 }
  0x4e   : > { %1269 = vmatprep.subr.bf16.mxu0 %v1268_v14 }
  0x51   : > { %1271 = vmatpush3.bf16.msra.mxu0 %v1268_v14 }
  0x52   : > { %1273 = vmatprep.subr.bf16.mxu0 %v1272_v17 }
  0x55   : > { %1275 = vmatpush3.bf16.msra.mxu0 %v1272_v17 }
  0x56   : > { %1277 = vmatprep.subr.bf16.mxu0 %v1276_v20 }
  0x59   : > { %1279 = vmatpush3.bf16.msra.mxu0 %v1276_v20 }
  0x5a   : > { %1281 = vmatprep.subr.bf16.mxu0 %v1280_v26 }
  0x5d   : > { %1283 = vmatpush3.bf16.msra.mxu0 %v1280_v26 }
 0x113   : > { %v1098_v38 = vpop.f32.mrb[0].mxu0 }
 0x114   : > { %v515_v39 = vadd.f32 %v1098_v38, %v918_v37  ;;  %v496_v40 = vpop.f32.mrb[1].mxu0 }
 0x115   : > { %v514_v41 = vadd.f32 %v918_v37, %v496_v40 }
 0x116   : > { %519 = vst [vmem:[#allocation2 + $0x9] sm:$0xff] %v515_v39 }
 0x117   : > { %518 = vst [vmem:[#allocation2 + $0x1] sm:$0xff] %v514_v41  ;;  %1131 = vmatprep.mubr.f32.mxu0 %v514_v41 }
 0x118   : > { %1132 = vmatmul.mubr.f32.vlgmr.msra.gmra.mrb[2].mxu0 %v515_v39 }
 0x11d   : > { %v708_v2 = vld [vmem:[#allocation2 + $0xa] sm:$0xff] }
 0x11e   : > { %v520_v44 = vld [vmem:[#allocation2] sm:$0xff]  ;;  %v521_v45 = vld [vmem:[#allocation2 + $0x8] sm:$0xff] }
 0x11f   : > { %1166 = vmatprep.mubr.f32.mxu1 %v520_v44  ;;  %v707_v49 = vld [vmem:[#allocation2 + $0x2] sm:$0xff] }
 0x120   : > { %1167 = vmatmul.mubr.f32.vlgmr.msra.gmra.mrb[0].mxu1 %v521_v45 }
 0x121   : > { %1319 = vmatpush3.bf16.msra.mxu1 %v1316_v36  ;;  %1201 = vmatprep.mubr.f32.mxu1 %v707_v49 }
 0x122   : > { %1321 = vmatprep.subr.bf16.mxu1 %v1320_v46 }
 0x125   : > { %1323 = vmatpush3.bf16.msra.mxu1 %v1320_v46 }
 0x126   : > { %1325 = vmatprep.subr.bf16.mxu1 %v1324_v50 }
 0x129   : > { %1327 = vmatpush3.bf16.msra.mxu1 %v1324_v50 }
 0x12a   : > { %1329 = vmatprep.subr.bf16.mxu1 %v1328_v53 }
 0x12d   : > { %1331 = vmatpush3.bf16.msra.mxu1 %v1328_v53 }
 0x12e   : > { %1333 = vmatprep.subr.bf16.mxu1 %v1332_v56 }
 0x131   : > { %1335 = vmatpush3.bf16.msra.mxu1 %v1332_v56 }
 0x132   : > { %1337 = vmatprep.subr.bf16.mxu1 %v1336_v59 }
 0x135   : > { %1339 = vmatpush3.bf16.msra.mxu1 %v1336_v59 }
 0x136   : > { %1341 = vmatprep.subr.bf16.mxu1 %v1340_v62 }
 0x139   : > { %1343 = vmatpush3.bf16.msra.mxu1 %v1340_v62 }
 0x13a   : > { %1345 = vmatprep.subr.bf16.mxu1 %v1344_v1 }
 0x13d   : > { %1347 = vmatpush3.bf16.msra.mxu1 %v1344_v1 }
 0x140   : > { %1202 = vmatmul.mubr.f32.vlgmr.msra.gmra.mrb[0].mxu1 %v708_v2 }
 0x1eb   : > { %v1133_v3 = vpop.f32.mrb[2].mxu0 }
 0x1ec   : > { %v623_v4 = vpop.f32.mrb[3].mxu0 }
 0x213   : > { %v1203_v5 = vpop.f32.mrb[0].mxu1 }
 0x214   : > { %v1348_v7 = vadd.f32 %v1203_v5, %v1133_v3  ;;  %v792_v8 = vpop.f32.mrb[1].mxu1 }
 0x215   : > { %v1349_v9 = vadd.f32 %v792_v8, %v623_v4 }
 0x216   : > { %v811_v10 = vadd.f32 %v1348_v7, %v951_v6 }
 0x217   : > { %v810_v11 = vadd.f32 %v1349_v9, %v951_v6 }
 0x218   : > { %813 = vst.msk [vmem:[%s217_s16 + $0x8] sm:$0xff] %vm252_vm1, %v811_v10 }
 0x219   : > { %812 = vst.msk [vmem:[%s217_s16] sm:$0xff] %vm252_vm1, %v810_v11 }
 0x21a   : > { %1412 = shalt.err (!%p1409_p3)
}
 0x21b   : > { %s1413_s10 = scalar_lea.hbm %s1801_s30, 256  ;;  %s1417_s13 = scalar_lea.hbm %s1853_s5, 512 }
 0x21c   : > { %p1414_p4 = scmp.ne.s32.totalorder %s1801_s30, %s1413_s10  ;;  %p1418_p9 = scmp.lt.u32.totalorder %s1801_s30, %s1853_s5 }
 0x21d   : > { %p1419_p10 = scmp.lt.u32.totalorder %s1417_s13, %s1413_s10  ;;  %p1421_p12 = scmp.lt.u32.totalorder %s1413_s10, %s1801_s30 }
 0x21e   : > { %p1415_p7 = pnand %p1414_p4, %p1535_p5 }
 0x21f   : > { %p1420_p11 = por %p1419_p10, %p1418_p9 }
 0x220   : > { %p1416_p8 = pneg %p1415_p7 }
 0x221   : > { %p1422_p13 = por %p1421_p12, %p1420_p11 }
 0x223   : > { %p1423_p0 = pnand %p1422_p13, %p1416_p8 }
 0x225   : > { %1426 = shalt.err (!%p1423_p0)
}
 0x226   : > { %s1465_s16 = smov 128   ;;  %s1466_s23 = smov 8  }
 0x227   : > { %1357 = dma.vmem_to_hbm [thread:$0]  (%p1535_p5), %s1803_s17, 256, %s1801_s30, %s1807_s22, %s1465_s16, %s1465_s16, %s1466_s23  }
 0x228 PF: > { %p1363_p1 = scmp.ge.s32.totalorder %s1461_s21, 2  ;;  %s843_s25 = sand.u32 1, %s1449_s18  }
 0x229   : > { %s844_s26 = scalar_lea.sflag [#allocation4], %s843_s25 }
 0x22a   : > { %p1360_p2 = pnand %p1363_p1, %p1539_p6 }
 0x22c   : > { %1444 = dma.done.wait (!%p1360_p2), %s844_s26, 256  }
 0x22d   : > { %1446 = vsyncadd (!%p1360_p2), %s844_s26, 4294967040  ;;  %p15_p3 = scmp.ge.s32.totalorder %s1522_s24, 4   ;;  %s1856_s18 = smov %s1453_s19 }
 0x22e   : > { %s1857_s19 = smov %s1457_s20  ;;  %s1858_s20 = smov %s1533_s27 }
 0x22f   : > { %s1859_s21 = smov %s1522_s24  ;;  %17 = sbr.rel (!%p15_p3) target bundleno = 3 (0x3), region = 79 }
 0x236   :  { %849 = vsyncpa [#allocation4], 1 }
 0x237   :  { %851 = vsyncpa [#allocation4 + $0x1], 1 }

</bundles_post_ra>
